<compile_context>
chip_gen: v7x
topology: tpu7x:2x2x1
jax: 0.10.0
libtpu: 0.0.40
codegen_flags: <defaults>
</compile_context>

<pallas_src>
import jax
import jax.numpy as jnp
from jax.experimental import pallas as pl
from jax.experimental.pallas import tpu as pltpu

HIDDEN = 256
LANE = 128
BF16_SUBLANE = 16                     # a bf16 vreg is [16, 128]
VMEM_BUDGET = 20 * 1024 * 1024        # activation + weight working-set budget
VMEM_LIMIT = 28 * 1024 * 1024         # scoped VMEM handed to Mosaic (ok v5e..v7x)


def _round_up(x, m):
    return (x + m - 1) // m * m


def multimodal_kernel(img_ref, txt_ref,
                      w_img_ref, w_txt_ref, w_fus_ref,
                      vec_ref, b_fus_ref, b_gate_ref,
                      out_ref):
    # Packed per-hidden f32 vectors: rows = [b_img, b_txt, gate_img, gate_txt].
    b_img = vec_ref[0:1, :]
    b_txt = vec_ref[1:2, :]
    ga_img = vec_ref[2:3, :]
    ga_txt = vec_ref[3:4, :]

    # image branch: relu(Linear(image_dim -> 256)); bf16 MXU, f32 accumulate
    img = jnp.dot(img_ref[...], w_img_ref[...],
                  preferred_element_type=jnp.float32) + b_img
    img = jnp.maximum(img, 0.0)

    # text branch: relu(Linear(text_dim -> 256)); zero-padded K is a no-op
    txt = jnp.dot(txt_ref[...], w_txt_ref[...],
                  preferred_element_type=jnp.float32) + b_txt
    txt = jnp.maximum(txt, 0.0)

    # attention over the (virtual) concatenation, reduced to a scalar gate:
    #   softmax(Linear(512->2))[:, 0] == sigmoid(l0 - l1)
    # with (l0 - l1) = img @ (Wa_i[:,0]-Wa_i[:,1]) + txt @ (Wa_t[:,0]-Wa_t[:,1])
    #                  + (b0 - b1)
    d = (jnp.sum(img * ga_img + txt * ga_txt, axis=1, keepdims=True)
         + b_gate_ref[0])                    # scalar gate bias from SMEM
    w_image = 1.0 / (1.0 + jnp.exp(-d))      # EUP exp: free bundle slot
    fused = w_image * img + (1.0 - w_image) * txt

    # classifier Linear(256 -> num_classes_padded); lane-dense bf16 store
    out_ref[...] = (jnp.dot(fused.astype(w_fus_ref.dtype), w_fus_ref[...],
                            preferred_element_type=jnp.float32)
                    + b_fus_ref[...]).astype(out_ref.dtype)


def init_params(key, image_dim, text_dim, num_classes, hidden=HIDDEN):
    ks = jax.random.split(key, 8)
    scale = 0.02
    return {
        "w_img": scale * jax.random.normal(ks[0], (image_dim, hidden), jnp.float32),
        "b_img": scale * jax.random.normal(ks[1], (1, hidden), jnp.float32),
        "w_txt": scale * jax.random.normal(ks[2], (text_dim, hidden), jnp.float32),
        "b_txt": scale * jax.random.normal(ks[3], (1, hidden), jnp.float32),
        # attention Linear(512, 2) split into image / text halves
        "w_att_img": scale * jax.random.normal(ks[4], (hidden, 2), jnp.float32),
        "w_att_txt": scale * jax.random.normal(ks[5], (hidden, 2), jnp.float32),
        "b_att": scale * jax.random.normal(ks[6], (1, 2), jnp.float32),
        "w_fus": scale * jax.random.normal(ks[7], (hidden, num_classes), jnp.float32),
        "b_fus": jnp.zeros((1, num_classes), jnp.float32),
    }


def _pick_batch_tile(B, image_dim_p, text_dim_p, out_p, hidden, batch_tile):
    """Largest 16-aligned batch tile whose double-buffered bf16 activations
    plus single-buffered resident weights fit under VMEM_BUDGET.  Re-derived
    per call, so it stays valid on v7x's 64 MiB physical VMEM as well as the
    128 MiB parts."""
    resident = (2 * ((image_dim_p + text_dim_p) * hidden + hidden * out_p)
                + 4 * (4 * hidden + out_p + 1))
    per_row = 2 * 2 * (image_dim_p + text_dim_p + out_p)   # 2 bufs x 2 B/elem
    cap = 4096 if batch_tile is None else batch_tile
    tb = min(_round_up(B, BF16_SUBLANE), _round_up(cap, BF16_SUBLANE))
    fit = max(BF16_SUBLANE,
              ((VMEM_BUDGET - resident) // per_row // BF16_SUBLANE)
              * BF16_SUBLANE)
    return max(BF16_SUBLANE, min(tb, fit))


def multimodal_forward(image_features, text_features, params, *, batch_tile=None):
    B = image_features.shape[0]
    hidden = params["w_img"].shape[1]
    num_classes = params["w_fus"].shape[1]

    # NCHW .reshape(B, -1) matches torch .view(B, -1) (both row-major).
    img_flat = image_features.reshape(B, -1)
    txt_flat = text_features.reshape(B, -1)
    image_dim, text_dim = img_flat.shape[1], txt_flat.shape[1]

    # Lane-align contraction and output dims; 16-align / tile the batch.
    image_dim_p = _round_up(image_dim, LANE)
    text_dim_p = _round_up(text_dim, LANE)
    out_p = _round_up(num_classes, LANE)
    tb = _pick_batch_tile(B, image_dim_p, text_dim_p, out_p, hidden, batch_tile)
    b_p = _round_up(B, tb)

    def prep(x, rows, cols, dtype):
        # Cast first (so any pad copy moves half the bytes); skip the pad
        # entirely when the array is already tile-aligned.
        x = x.astype(dtype)
        if x.shape != (rows, cols):
            x = jnp.pad(x, ((0, rows - x.shape[0]), (0, cols - x.shape[1])))
        return x

    img_p = prep(img_flat, b_p, image_dim_p, jnp.bfloat16)
    txt_p = prep(txt_flat, b_p, text_dim_p, jnp.bfloat16)
    w_img = prep(params["w_img"], image_dim_p, hidden, jnp.bfloat16)
    w_txt = prep(params["w_txt"], text_dim_p, hidden, jnp.bfloat16)
    w_fus = prep(params["w_fus"], hidden, out_p, jnp.bfloat16)
    b_fus = prep(params["b_fus"], 1, out_p, jnp.float32)

    # Fold attention Linear(512,2) into gate vectors; pack the four f32
    # per-hidden vectors into one resident (4, hidden) array.
    vec_pack = jnp.stack([
        params["b_img"].reshape(-1),
        params["b_txt"].reshape(-1),
        params["w_att_img"][:, 0] - params["w_att_img"][:, 1],
        params["w_att_txt"][:, 0] - params["w_att_txt"][:, 1],
    ], axis=0).astype(jnp.float32)
    b_gate = (params["b_att"].reshape(-1)[0]
              - params["b_att"].reshape(-1)[1]).reshape(1).astype(jnp.float32)

    grid = (b_p // tb,)

    def act_spec(cols):
        return pl.BlockSpec((tb, cols), lambda i: (i, 0))

    def resident(shape):      # VMEM-resident weights: single pipeline buffer
        return pl.BlockSpec(shape, lambda i: (0, 0),
                            pipeline_mode=pl.Buffered(1))

    flops = 2 * b_p * hidden * (image_dim_p + text_dim_p + out_p) + 10 * b_p * hidden
    bytes_accessed = (2 * (img_p.size + txt_p.size + w_img.size + w_txt.size
                           + w_fus.size + b_p * out_p)
                      + 4 * (vec_pack.size + b_fus.size + b_gate.size))

    out = pl.pallas_call(
        multimodal_kernel,
        out_shape=jax.ShapeDtypeStruct((b_p, out_p), jnp.bfloat16),
        grid=grid,
        in_specs=[
            act_spec(image_dim_p),
            act_spec(text_dim_p),
            resident((image_dim_p, hidden)),
            resident((text_dim_p, hidden)),
            resident((hidden, out_p)),
            resident((4, hidden)),
            resident((1, out_p)),
            pl.BlockSpec(memory_space=pltpu.MemorySpace.SMEM),   # gate bias scalar
        ],
        out_specs=pl.BlockSpec((tb, out_p), lambda i: (i, 0)),
        compiler_params=pltpu.CompilerParams(
            # batch axis: sharded across TCs on v7x, plain serial loop elsewhere
            dimension_semantics=("parallel",),
            vmem_limit_bytes=VMEM_LIMIT,
            # let XLA fuse the reshape/cast/pad producers into the input DMA
            allow_input_fusion=[True, True, False, False, False, False, False, False],
        ),
        cost_estimate=pl.CostEstimate(
            flops=flops, transcendentals=b_p, bytes_accessed=bytes_accessed),
    )(img_p, txt_p, w_img, w_txt, w_fus, vec_pack, b_fus, b_gate)

    return out[:B, :num_classes].astype(jnp.float32)


def reference_forward(image_features, text_features, params):
    """Pure-JAX reference matching the PyTorch forward semantics.

    Matmuls emulate the kernel's bf16-input / f32-accumulate policy and the
    final bf16 output store so the comparison is tight; attention uses the
    original concat + softmax form to verify the sigmoid-gate equivalence."""
    B = image_features.shape[0]

    def bf16_dot(x, w):
        return jnp.dot(x.astype(jnp.bfloat16), w.astype(jnp.bfloat16),
                       preferred_element_type=jnp.float32)

    img = jnp.maximum(bf16_dot(image_features.reshape(B, -1), params["w_img"])
                      + params["b_img"], 0.0)
    txt = jnp.maximum(bf16_dot(text_features.reshape(B, -1), params["w_txt"])
                      + params["b_txt"], 0.0)
    combined = jnp.concatenate([img, txt], axis=1)
    w_att_full = jnp.concatenate([params["w_att_img"], params["w_att_txt"]],
                                 axis=0)
    scores = jax.nn.softmax(combined @ w_att_full + params["b_att"], axis=1)
    fused = scores[:, 0:1] * img + scores[:, 1:2] * txt
    out = bf16_dot(fused, params["w_fus"]) + params["b_fus"]
    return out.astype(jnp.bfloat16).astype(jnp.float32)   # kernel stores bf16


if __name__ == "__main__":
    key = jax.random.PRNGKey(0)
    k_img, k_txt, k_par = jax.random.split(key, 3)

    B, C, H, W = 2, 4, 16, 16          # image input (NCHW)
    text_dim = 64
    num_classes = 10
    image_dim = C * H * W              # 1024 after flatten

    image_features = jax.random.normal(k_img, (B, C, H, W), jnp.float32)
    text_features = jax.random.normal(k_txt, (B, text_dim), jnp.float32)
    params = init_params(k_par, image_dim, text_dim, num_classes)

    out = multimodal_forward(image_features, text_features, params)
    out = jax.block_until_ready(out)

    ref = reference_forward(image_features, text_features, params)
    assert out.shape == (B, num_classes)
    assert jnp.allclose(out, ref, atol=5e-3, rtol=5e-3), "mismatch vs reference"

    print("KERNEL_OK")
</pallas_src>

<mosaic_0001>
module attributes {stable_mosaic.version = 11 : i64} {
  func.func @multimodal_kernel(%arg0: i32, %arg1: memref<16x1024xbf16, #tpu.memory_space<vmem>>, %arg2: memref<16x128xbf16, #tpu.memory_space<vmem>>, %arg3: memref<1024x256xbf16, #tpu.memory_space<vmem>>, %arg4: memref<128x256xbf16, #tpu.memory_space<vmem>>, %arg5: memref<256x128xbf16, #tpu.memory_space<vmem>>, %arg6: memref<4x256xf32, #tpu.memory_space<vmem>>, %arg7: memref<1x128xf32, #tpu.memory_space<vmem>>, %arg8: memref<1xf32, #tpu.memory_space<smem>>, %arg9: memref<16x128xbf16, #tpu.memory_space<vmem>>) attributes {dimension_semantics = [#tpu.dimension_semantics<parallel>], iteration_bounds = array<i64: 1>, scalar_prefetch = 0 : i64, scratch_operands = 0 : i64, tpu.core_type = #tpu.core_type<tc>, window_params = [{transform_indices = @transform_0, window_bounds = array<i64: 16, 1024>}, {transform_indices = @transform_1, window_bounds = array<i64: 16, 128>}, {pipeline_mode = #tpu.pipeline_mode<synchronous>, transform_indices = @transform_2, window_bounds = array<i64: 1024, 256>}, {pipeline_mode = #tpu.pipeline_mode<synchronous>, transform_indices = @transform_3, window_bounds = array<i64: 128, 256>}, {pipeline_mode = #tpu.pipeline_mode<synchronous>, transform_indices = @transform_4, window_bounds = array<i64: 256, 128>}, {pipeline_mode = #tpu.pipeline_mode<synchronous>, transform_indices = @transform_5, window_bounds = array<i64: 4, 256>}, {pipeline_mode = #tpu.pipeline_mode<synchronous>, transform_indices = @transform_6, window_bounds = array<i64: 1, 128>}, {transform_indices = @transform_7, window_bounds = array<i64: 1>}, {transform_indices = @transform_8, window_bounds = array<i64: 16, 128>}]} {
    %c0 = arith.constant 0 : index
    %c0_0 = arith.constant 0 : index
    %0 = vector.load %arg6[%c0, %c0_0] : memref<4x256xf32, #tpu.memory_space<vmem>>, vector<1x256xf32>
    %c1 = arith.constant 1 : index
    %c0_1 = arith.constant 0 : index
    %1 = vector.load %arg6[%c1, %c0_1] : memref<4x256xf32, #tpu.memory_space<vmem>>, vector<1x256xf32>
    %c2 = arith.constant 2 : index
    %c0_2 = arith.constant 0 : index
    %2 = vector.load %arg6[%c2, %c0_2] : memref<4x256xf32, #tpu.memory_space<vmem>>, vector<1x256xf32>
    %c3 = arith.constant 3 : index
    %c0_3 = arith.constant 0 : index
    %3 = vector.load %arg6[%c3, %c0_3] : memref<4x256xf32, #tpu.memory_space<vmem>>, vector<1x256xf32>
    %c0_4 = arith.constant 0 : index
    %c0_5 = arith.constant 0 : index
    %4 = vector.load %arg1[%c0_4, %c0_5] : memref<16x1024xbf16, #tpu.memory_space<vmem>>, vector<16x1024xbf16>
    %c0_6 = arith.constant 0 : index
    %c0_7 = arith.constant 0 : index
    %5 = vector.load %arg3[%c0_6, %c0_7] : memref<1024x256xbf16, #tpu.memory_space<vmem>>, vector<1024x256xbf16>
    %cst = arith.constant dense<0.000000e+00> : vector<16x256xf32>
    %6 = tpu.matmul %4, %5, %cst {dimension_numbers = #tpu.dot_dimension_numbers<[1], [0], [0], [1], [0, 0, 1, 1], [], []>} : vector<16x1024xbf16>, vector<1024x256xbf16>, vector<16x256xf32> -> vector<16x256xf32>
    %7 = vector.broadcast %0 : vector<1x256xf32> to vector<16x256xf32>
    %8 = arith.addf %6, %7 : vector<16x256xf32>
    %cst_8 = arith.constant 0.000000e+00 : f32
    %9 = vector.broadcast %cst_8 : f32 to vector<16x256xf32>
    %10 = arith.maximumf %8, %9 : vector<16x256xf32>
    %c0_9 = arith.constant 0 : index
    %c0_10 = arith.constant 0 : index
    %11 = vector.load %arg2[%c0_9, %c0_10] : memref<16x128xbf16, #tpu.memory_space<vmem>>, vector<16x128xbf16>
    %c0_11 = arith.constant 0 : index
    %c0_12 = arith.constant 0 : index
    %12 = vector.load %arg4[%c0_11, %c0_12] : memref<128x256xbf16, #tpu.memory_space<vmem>>, vector<128x256xbf16>
    %cst_13 = arith.constant dense<0.000000e+00> : vector<16x256xf32>
    %13 = tpu.matmul %11, %12, %cst_13 {dimension_numbers = #tpu.dot_dimension_numbers<[1], [0], [0], [1], [0, 0, 1, 1], [], []>} : vector<16x128xbf16>, vector<128x256xbf16>, vector<16x256xf32> -> vector<16x256xf32>
    %14 = vector.broadcast %1 : vector<1x256xf32> to vector<16x256xf32>
    %15 = arith.addf %13, %14 : vector<16x256xf32>
    %cst_14 = arith.constant 0.000000e+00 : f32
    %16 = vector.broadcast %cst_14 : f32 to vector<16x256xf32>
    %17 = arith.maximumf %15, %16 : vector<16x256xf32>
    %18 = vector.broadcast %2 : vector<1x256xf32> to vector<16x256xf32>
    %19 = arith.mulf %10, %18 : vector<16x256xf32>
    %20 = vector.broadcast %3 : vector<1x256xf32> to vector<16x256xf32>
    %21 = arith.mulf %17, %20 : vector<16x256xf32>
    %22 = arith.addf %19, %21 : vector<16x256xf32>
    %cst_15 = arith.constant dense<0.000000e+00> : vector<16xf32>
    %23 = vector.multi_reduction <add>, %22, %cst_15 [1] : vector<16x256xf32> to vector<16xf32>
    %24 = vector.shape_cast %23 : vector<16xf32> to vector<16x1xf32>
    %c0_16 = arith.constant 0 : index
    %25 = memref.load %arg8[%c0_16] : memref<1xf32, #tpu.memory_space<smem>>
    %26 = vector.broadcast %25 : f32 to vector<16x1xf32>
    %27 = arith.addf %24, %26 : vector<16x1xf32>
    %cst_17 = arith.constant 0.000000e+00 : f32
    %28 = vector.broadcast %cst_17 : f32 to vector<16x1xf32>
    %29 = arith.subf %28, %27 : vector<16x1xf32>
    %30 = math.exp %29 : vector<16x1xf32>
    %cst_18 = arith.constant 1.000000e+00 : f32
    %31 = vector.broadcast %cst_18 : f32 to vector<16x1xf32>
    %32 = arith.addf %31, %30 : vector<16x1xf32>
    %cst_19 = arith.constant 1.000000e+00 : f32
    %33 = vector.broadcast %cst_19 : f32 to vector<16x1xf32>
    %34 = arith.divf %33, %32 : vector<16x1xf32>
    %35 = vector.broadcast %34 : vector<16x1xf32> to vector<16x256xf32>
    %36 = arith.mulf %35, %10 : vector<16x256xf32>
    %cst_20 = arith.constant 1.000000e+00 : f32
    %37 = vector.broadcast %cst_20 : f32 to vector<16x1xf32>
    %38 = arith.subf %37, %34 : vector<16x1xf32>
    %39 = vector.broadcast %38 : vector<16x1xf32> to vector<16x256xf32>
    %40 = arith.mulf %39, %17 : vector<16x256xf32>
    %41 = arith.addf %36, %40 : vector<16x256xf32>
    %42 = arith.truncf %41 : vector<16x256xf32> to vector<16x256xbf16>
    %c0_21 = arith.constant 0 : index
    %c0_22 = arith.constant 0 : index
    %43 = vector.load %arg5[%c0_21, %c0_22] : memref<256x128xbf16, #tpu.memory_space<vmem>>, vector<256x128xbf16>
    %cst_23 = arith.constant dense<0.000000e+00> : vector<16x128xf32>
    %44 = tpu.matmul %42, %43, %cst_23 {dimension_numbers = #tpu.dot_dimension_numbers<[1], [0], [0], [1], [0, 0, 1, 1], [], []>} : vector<16x256xbf16>, vector<256x128xbf16>, vector<16x128xf32> -> vector<16x128xf32>
    %c0_24 = arith.constant 0 : index
    %c0_25 = arith.constant 0 : index
    %45 = vector.load %arg7[%c0_24, %c0_25] : memref<1x128xf32, #tpu.memory_space<vmem>>, vector<1x128xf32>
    %46 = vector.broadcast %45 : vector<1x128xf32> to vector<16x128xf32>
    %47 = arith.addf %44, %46 : vector<16x128xf32>
    %48 = arith.truncf %47 : vector<16x128xf32> to vector<16x128xbf16>
    %c0_26 = arith.constant 0 : index
    %c0_27 = arith.constant 0 : index
    %49 = vector.load %arg9[%c0_26, %c0_27] : memref<16x128xbf16, #tpu.memory_space<vmem>>, vector<16x128xbf16>
    tpu.vector_store %arg9[%c0_26, %c0_27], %48 {strides = array<i32>} : memref<16x128xbf16, #tpu.memory_space<vmem>>, vector<16x128xbf16>,
    return
  }
  func.func @transform_0(%arg0: i32) -> (i32, i32) {
    %c0_i32 = arith.constant 0 : i32
    %c0_i32_0 = arith.constant 0 : i32
    return %arg0, %c0_i32 : i32, i32
  }
  func.func @transform_1(%arg0: i32) -> (i32, i32) {
    %c0_i32 = arith.constant 0 : i32
    %c0_i32_0 = arith.constant 0 : i32
    return %arg0, %c0_i32 : i32, i32
  }
  func.func @transform_2(%arg0: i32) -> (i32, i32) {
    %c0_i32 = arith.constant 0 : i32
    %c0_i32_0 = arith.constant 0 : i32
    %c0_i32_1 = arith.constant 0 : i32
    return %c0_i32, %c0_i32_0 : i32, i32
  }
  func.func @transform_3(%arg0: i32) -> (i32, i32) {
    %c0_i32 = arith.constant 0 : i32
    %c0_i32_0 = arith.constant 0 : i32
    %c0_i32_1 = arith.constant 0 : i32
    return %c0_i32, %c0_i32_0 : i32, i32
  }
  func.func @transform_4(%arg0: i32) -> (i32, i32) {
    %c0_i32 = arith.constant 0 : i32
    %c0_i32_0 = arith.constant 0 : i32
    %c0_i32_1 = arith.constant 0 : i32
    return %c0_i32, %c0_i32_0 : i32, i32
  }
  func.func @transform_5(%arg0: i32) -> (i32, i32) {
    %c0_i32 = arith.constant 0 : i32
    %c0_i32_0 = arith.constant 0 : i32
    %c0_i32_1 = arith.constant 0 : i32
    return %c0_i32, %c0_i32_0 : i32, i32
  }
  func.func @transform_6(%arg0: i32) -> (i32, i32) {
    %c0_i32 = arith.constant 0 : i32
    %c0_i32_0 = arith.constant 0 : i32
    %c0_i32_1 = arith.constant 0 : i32
    return %c0_i32, %c0_i32_0 : i32, i32
  }
  func.func @transform_7(%arg0: i32) -> i32 {
    %c0_i32 = arith.constant 0 : i32
    %c0_i32_0 = arith.constant 0 : i32
    return %c0_i32 : i32
  }
  func.func @transform_8(%arg0: i32) -> (i32, i32) {
    %c0_i32 = arith.constant 0 : i32
    %c0_i32_0 = arith.constant 0 : i32
    return %arg0, %c0_i32 : i32, i32
  }
}

</mosaic_0001>

<bundles_post_ra>
// kernel: tpu_custom_call.1
= control target key start
LH: loop header
LB: loop body
LE: loop exit
PB: predicated region body
PF: predicated region fallthrough
CT: control target
= control target key end

     0   :  { %14 = vsyncpa [#allocation4], 0  ;;  %s2406_s0 = inlined_call_operand.hbm [shape: bf16[16,1024], index: 0, kind: input, shape index: {}]   ;;  %s2407_s1 = inlined_call_operand.hbm [shape: bf16[16,128], index: 1, kind: input, shape index: {}]   ;;  %s2408_s2 = inlined_call_operand.hbm [shape: bf16[1024,256], index: 2, kind: input, shape index: {}]   ;;  %s2409_s3 = inlined_call_operand.hbm [shape: bf16[128,256], index: 3, kind: input, shape index: {}]   ;;  %s2410_s4 = inlined_call_operand.hbm [shape: bf16[256,128], index: 4, kind: input, shape index: {}]   ;;  %s2411_s5 = inlined_call_operand.vmem [shape: f32[4,256], index: 5, kind: input, shape index: {}]   ;;  %s2412_s6 = inlined_call_operand.vmem [shape: f32[1,128], index: 6, kind: input, shape index: {}]   ;;  %s2413_s7 = inlined_call_operand.<no memory space> [shape: f32[1], index: 7, kind: input, shape index: {}]   ;;  %s2414_s8 = inlined_call_operand.hbm [shape: bf16[16,128], index: 8, kind: output, shape index: {}]  }
   0x1   :  { %15 = vsyncpa [#allocation7], 0 }
   0x2   :  { %16 = vsyncpa [#allocation10], 0 }
   0x3   :  { %17 = vsyncpa [#allocation5], 0  ;;  %s2163_s27 = smov [#allocation6]   ;;  %s2023_s9 = scalar_lea.hbm %s2407_s1, 128 }
   0x4   :  { %s35_s28 = sshll.u32 %s2163_s27, 4  ;;  %p2024_p0 = scmp.ne.s32.totalorder %s2407_s1, %s2023_s9  ;;  %s36_s28 = int_to_ptr.vmem [resolvable:$true] %s35_s28 }
   0x5   :  { %p2027_p1 = scmp.lt.u32.totalorder %s2023_s9, %s2407_s1 }
   0x7   :  { %p2029_p2 = pnand %p2027_p1, %p2024_p0 }
   0x9   :  { %2032 = shalt.err (!%p2029_p2)
}
   0xa   :  { %s2033_s14 = scalar_lea.vmem %s36_s28, 128  ;;  %p2038_p4 = scmp.lt.s32.totalorder %s36_s28, %s36_s28 }
   0xb   :  { %p2034_p3 = scmp.ne.s32.totalorder %s36_s28, %s2033_s14  ;;  %p2039_p5 = scmp.lt.s32.totalorder %s2033_s14, %s2033_s14 }
   0xd   :  { %p2040_p6 = por %p2039_p5, %p2038_p4 }
   0xf   :  { %p2041_p7 = pnand %p2040_p6, %p2034_p3 }
  0x11   :  { %2044 = shalt.err (!%p2041_p7)
}
  0x12   :  { %s2164_s15 = smov 64   ;;  %s2165_s16 = smov 4  }
  0x13   :  { %41 = dma.hbm_to_vmem [thread:$0]  %s2407_s1, 128, %s36_s28, [#allocation7], %s2164_s15, %s2164_s15, %s2165_s16  }
  0x14   :  { %s2166_s19 = smov [#allocation9]   ;;  %s2167_s21 = smov [#allocation3]  }
  0x15   :  { %s59_s20 = sshll.u32 %s2166_s19, 4  ;;  %s23_s22 = sshll.u32 %s2167_s21, 4  ;;  %s60_s20 = int_to_ptr.vmem [resolvable:$true] %s59_s20  ;;  %s24_s22 = int_to_ptr.vmem [resolvable:$true] %s23_s22 }
  0x16   :  { %s2045_s25 = scalar_lea.hbm %s2409_s3, 2048 }
  0x17   :  { %p2046_p8 = scmp.ne.s32.totalorder %s2409_s3, %s2045_s25  ;;  %p2049_p9 = scmp.lt.u32.totalorder %s2045_s25, %s2409_s3 }
  0x19   :  { %p2051_p10 = pnand %p2049_p9, %p2046_p8 }
  0x1b   :  { %2054 = shalt.err (!%p2051_p10)
}
  0x1c   :  { %s2055_s1 = scalar_lea.vmem %s60_s20, 2048  ;;  %p2060_p12 = scmp.lt.s32.totalorder %s60_s20, %s60_s20 }
  0x1d   :  { %p2056_p11 = scmp.ne.s32.totalorder %s60_s20, %s2055_s1  ;;  %p2061_p13 = scmp.lt.s32.totalorder %s2055_s1, %s2055_s1 }
  0x1f   :  { %p2062_p0 = por %p2061_p13, %p2060_p12 }
  0x21   :  { %p2063_p1 = pnand %p2062_p0, %p2056_p11 }
  0x23   :  { %2066 = shalt.err (!%p2063_p1)
}
  0x24   :  { %s2168_s28 = smov 128   ;;  %s2169_s9 = smov 8  }
  0x25   :  { %65 = dma.hbm_to_vmem [thread:$0]  %s2409_s3, 2048, %s60_s20, [#allocation10], %s2168_s28, %s2168_s28, %s2169_s9  }
  0x26   :  { %s2067_s14 = scalar_lea.hbm %s2406_s0, 1024 }
  0x27   :  { %p2068_p2 = scmp.ne.s32.totalorder %s2406_s0, %s2067_s14  ;;  %p2071_p3 = scmp.lt.u32.totalorder %s2067_s14, %s2406_s0 }
  0x29   :  { %p2073_p4 = pnand %p2071_p3, %p2068_p2 }
  0x2b   :  { %2076 = shalt.err (!%p2073_p4)
}
  0x2c   :  { %s2077_s23 = scalar_lea.vmem %s24_s22, 1024  ;;  %p2082_p6 = scmp.lt.s32.totalorder %s24_s22, %s24_s22 }
  0x2d   :  { %p2078_p5 = scmp.ne.s32.totalorder %s24_s22, %s2077_s23  ;;  %p2083_p7 = scmp.lt.s32.totalorder %s2077_s23, %s2077_s23 }
  0x2f   :  { %p2084_p8 = por %p2083_p7, %p2082_p6 }
  0x31   :  { %p2085_p9 = pnand %p2084_p8, %p2078_p5 }
  0x33   :  { %2088 = shalt.err (!%p2085_p9)
}
  0x34   :  { %s2170_s3 = smov 512   ;;  %s2171_s20 = smov 32  }
  0x35   :  { %29 = dma.hbm_to_vmem [thread:$0]  %s2406_s0, 1024, %s24_s22, [#allocation4], %s2170_s3, %s2170_s3, %s2171_s20  }
  0x36   :  { %s2172_s26 = smov [#allocation8]   ;;  %s2173_s29 = smov [#allocation11]  }
  0x37   :  { %s47_s27 = sshll.u32 %s2172_s26, 4  ;;  %s71_s30 = sshll.u32 %s2173_s29, 4  ;;  %s48_s27 = int_to_ptr.vmem [resolvable:$true] %s47_s27  ;;  %s72_s30 = int_to_ptr.vmem [resolvable:$true] %s71_s30 }
  0x38   :  { %s2089_s11 = scalar_lea.hbm %s2408_s2, 16384 }
  0x39   :  { %p2090_p10 = scmp.ne.s32.totalorder %s2408_s2, %s2089_s11  ;;  %p2093_p11 = scmp.lt.u32.totalorder %s2089_s11, %s2408_s2 }
  0x3b   :  { %p2095_p12 = pnand %p2093_p11, %p2090_p10 }
  0x3d   :  { %2098 = shalt.err (!%p2095_p12)
}
  0x3e   :  { %s2099_s0 = scalar_lea.vmem %s48_s27, 16384  ;;  %p2104_p0 = scmp.lt.s32.totalorder %s48_s27, %s48_s27 }
  0x3f   :  { %p2100_p13 = scmp.ne.s32.totalorder %s48_s27, %s2099_s0  ;;  %p2105_p1 = scmp.lt.s32.totalorder %s2099_s0, %s2099_s0 }
  0x41   :  { %p2106_p2 = por %p2105_p1, %p2104_p0 }
  0x43   :  { %p2107_p3 = pnand %p2106_p2, %p2100_p13 }
  0x45   :  { %2110 = shalt.err (!%p2107_p3)
}
  0x46   :  { %53 = dma.hbm_to_vmem [thread:$0]  %s2408_s2, 16384, %s48_s27, [#allocation7], %s2168_s28, %s2168_s28, %s2169_s9  }
  0x47   :  { %s2111_s23 = scalar_lea.hbm %s2410_s4, 2048 }
  0x48   :  { %p2112_p4 = scmp.ne.s32.totalorder %s2410_s4, %s2111_s23  ;;  %p2115_p5 = scmp.lt.u32.totalorder %s2111_s23, %s2410_s4 }
  0x4a   :  { %p2117_p6 = pnand %p2115_p5, %p2112_p4 }
  0x4c   :  { %2120 = shalt.err (!%p2117_p6)
}
  0x4d   :  { %s2121_s26 = scalar_lea.vmem %s72_s30, 2048  ;;  %p2126_p8 = scmp.lt.s32.totalorder %s72_s30, %s72_s30 }
  0x4e   :  { %p2122_p7 = scmp.ne.s32.totalorder %s72_s30, %s2121_s26  ;;  %p2127_p9 = scmp.lt.s32.totalorder %s2121_s26, %s2121_s26 }
  0x50   :  { %p2128_p10 = por %p2127_p9, %p2126_p8 }
  0x52   :  { %p2129_p11 = pnand %p2128_p10, %p2122_p7 }
  0x54   :  { %2132 = shalt.err (!%p2129_p11)
}
  0x55   :  { %77 = dma.hbm_to_vmem [thread:$0]  %s2410_s4, 2048, %s72_s30, [#allocation10], %s2164_s15, %s2164_s15, %s2165_s16  }
  0x56   :  { %2155 = dma.done.wait [#allocation4], 1024  }
  0x57   :  { %2156 = vsyncadd [#allocation4], 4294966272 }
  0x58   :  { %2157 = dma.done.wait [#allocation7], 16512  }
  0x59   :  { %2158 = vsyncadd [#allocation7], 4294950784 }
  0x5a   :  { %2159 = dma.done.wait [#allocation10], 4096  }
  0x5b   :  { %2160 = vsyncadd [#allocation10], 4294963200  ;;  %v1782_v0 = vld [vmem:[#allocation8 + $0x104] ss:$8 sps:$4 sm:$0xff]   ;;  %v1784_v1 = vld [vmem:[#allocation8 + $0x100] ss:$8 sps:$4 sm:$0xff]  }
  0x5c   :  { %977 = vmatprep.subr.bf16.mxu0 %v1782_v0  ;;  %v1785_v2 = vld [vmem:[#allocation8 + $0x114] ss:$8 sps:$4 sm:$0xff]   ;;  %v1787_v3 = vld [vmem:[#allocation8 + $0x110] ss:$8 sps:$4 sm:$0xff]   ;;  %v1788_v4 = vld [vmem:[#allocation8 + $0x124] ss:$8 sps:$4 sm:$0xff]  }
  0x5d   :  { %978 = vmatpush1.bf16.msra.mxu0 %v1784_v1  ;;  %v1790_v5 = vld [vmem:[#allocation8 + $0x120] ss:$8 sps:$4 sm:$0xff]   ;;  %v1791_v6 = vld [vmem:[#allocation8 + $0x134] ss:$8 sps:$4 sm:$0xff]   ;;  %v1793_v7 = vld [vmem:[#allocation8 + $0x130] ss:$8 sps:$4 sm:$0xff]  }
  0x5e   :  { %979 = vmatprep.subr.bf16.mxu0 %v1785_v2  ;;  %v1794_v8 = vld [vmem:[#allocation8 + $0x144] ss:$8 sps:$4 sm:$0xff]   ;;  %v1796_v9 = vld [vmem:[#allocation8 + $0x140] ss:$8 sps:$4 sm:$0xff]   ;;  %v1797_v10 = vld [vmem:[#allocation8 + $0x154] ss:$8 sps:$4 sm:$0xff]  }
  0x5f   :  { %v1799_v11 = vld [vmem:[#allocation8 + $0x150] ss:$8 sps:$4 sm:$0xff]   ;;  %v1800_v12 = vld [vmem:[#allocation8 + $0x164] ss:$8 sps:$4 sm:$0xff]   ;;  %v1802_v16 = vld [vmem:[#allocation8 + $0x160] ss:$8 sps:$4 sm:$0xff]  }
  0x60   :  { %v2293_v13 = vld [vmem:[#allocation3 + $0x8] sm:$0xff]  ;;  %v1803_v17 = vld [vmem:[#allocation8 + $0x174] ss:$8 sps:$4 sm:$0xff]   ;;  %v1805_v18 = vld [vmem:[#allocation8 + $0x170] ss:$8 sps:$4 sm:$0xff]   ;;  %s2175_s14 = smov [#allocation12]  }
  0x61   :  { %980 = vmatpush1.bf16.msra.mxu0 %v1787_v3  ;;  %v2295_v14 = vld [vmem:[#allocation3 + $0x28] sm:$0xff]  ;;  %v1809_v21 = vld [vmem:[#allocation8 + $0x194] ss:$8 sps:$4 sm:$0xff]   ;;  %v1811_v24 = vld [vmem:[#allocation8 + $0x190] ss:$8 sps:$4 sm:$0xff]   ;;  %s1535_s17 = sshll.u32 %s2175_s14, 4  ;;  %s1536_s17 = int_to_ptr.vmem [resolvable:$true] %s1535_s17 }
  0x62   :  { %981 = vmatprep.subr.bf16.mxu0 %v1788_v4  ;;  %v1555_v15 = vcombine.high %v2293_v13, %v2295_v14  ;;  %v1806_v19 = vld [vmem:[#allocation8 + $0x184] ss:$8 sps:$4 sm:$0xff]   ;;  %v1808_v20 = vld [vmem:[#allocation8 + $0x180] ss:$8 sps:$4 sm:$0xff]   ;;  %v1860_v26 = vld [vmem:[#allocation8 + $0x14] ss:$8 sps:$4 sm:$0xff]   ;;  %v1554_v55 = vcombine.low %v2293_v13, %v2295_v14  ;;  %p2138_p13 = scmp.lt.s32.totalorder %s1536_s17, %s1536_s17 }
  0x63   :  { %v1854_v22 = vld [vmem:[#allocation8 + $0x4] ss:$8 sps:$4 sm:$0xff]   ;;  %v1856_v23 = vld [vmem:[#allocation8] ss:$8 sps:$4 sm:$0xff]   ;;  %v1862_v27 = vld [vmem:[#allocation8 + $0x10] ss:$8 sps:$4 sm:$0xff]  }
  0x64   :  { %1009 = vmatprep.mubr.bf16.mxu0 %v1555_v15  ;;  %v1812_v25 = vld [vmem:[#allocation8 + $0x1a4] ss:$8 sps:$4 sm:$0xff]   ;;  %934 = vmatprep.subr.bf16.mxu1 %v1854_v22  ;;  %v1814_v29 = vld [vmem:[#allocation8 + $0x1a0] ss:$8 sps:$4 sm:$0xff]   ;;  %v1815_v30 = vld [vmem:[#allocation8 + $0x1b4] ss:$8 sps:$4 sm:$0xff]  }
  0x65   :  { %982 = vmatpush1.bf16.msra.mxu0 %v1790_v5  ;;  %935 = vmatpush1.bf16.msra.mxu1 %v1856_v23  ;;  %v1866_v28 = vld [vmem:[#allocation8 + $0x24] ss:$8 sps:$4 sm:$0xff]   ;;  %v1868_v31 = vld [vmem:[#allocation8 + $0x20] ss:$8 sps:$4 sm:$0xff]   ;;  %v1872_v32 = vld [vmem:[#allocation8 + $0x34] ss:$8 sps:$4 sm:$0xff]  }
  0x66   :  { %983 = vmatprep.subr.bf16.mxu0 %v1791_v6  ;;  %936 = vmatprep.subr.bf16.mxu1 %v1860_v26  ;;  %v1817_v33 = vld [vmem:[#allocation8 + $0x1b0] ss:$8 sps:$4 sm:$0xff]   ;;  %v1818_v34 = vld [vmem:[#allocation8 + $0x1c4] ss:$8 sps:$4 sm:$0xff]   ;;  %v1820_v37 = vld [vmem:[#allocation8 + $0x1c0] ss:$8 sps:$4 sm:$0xff]  }
  0x67   :  { %v1874_v35 = vld [vmem:[#allocation8 + $0x30] ss:$8 sps:$4 sm:$0xff]   ;;  %v1878_v36 = vld [vmem:[#allocation8 + $0x44] ss:$8 sps:$4 sm:$0xff]   ;;  %v1821_v38 = vld [vmem:[#allocation8 + $0x1d4] ss:$8 sps:$4 sm:$0xff]  }
  0x68   :  { %v1880_v39 = vld [vmem:[#allocation8 + $0x40] ss:$8 sps:$4 sm:$0xff]   ;;  %v1884_v40 = vld [vmem:[#allocation8 + $0x54] ss:$8 sps:$4 sm:$0xff]   ;;  %v1823_v41 = vld [vmem:[#allocation8 + $0x1d0] ss:$8 sps:$4 sm:$0xff]  }
  0x69   :  { %984 = vmatpush1.bf16.msra.mxu0 %v1793_v7  ;;  %937 = vmatpush1.bf16.msra.mxu1 %v1862_v27  ;;  %v1824_v42 = vld [vmem:[#allocation8 + $0x1e4] ss:$8 sps:$4 sm:$0xff]   ;;  %v1886_v43 = vld [vmem:[#allocation8 + $0x50] ss:$8 sps:$4 sm:$0xff]   ;;  %v1826_v45 = vld [vmem:[#allocation8 + $0x1e0] ss:$8 sps:$4 sm:$0xff]  }
  0x6a   :  { %985 = vmatprep.subr.bf16.mxu0 %v1794_v8  ;;  %938 = vmatprep.subr.bf16.mxu1 %v1866_v28  ;;  %v1890_v44 = vld [vmem:[#allocation8 + $0x64] ss:$8 sps:$4 sm:$0xff]   ;;  %v1827_v46 = vld [vmem:[#allocation8 + $0x1f4] ss:$8 sps:$4 sm:$0xff]   ;;  %v1892_v47 = vld [vmem:[#allocation8 + $0x60] ss:$8 sps:$4 sm:$0xff]  }
  0x6b   :  { %v1896_v48 = vld [vmem:[#allocation8 + $0x74] ss:$8 sps:$4 sm:$0xff]   ;;  %v1829_v49 = vld [vmem:[#allocation8 + $0x1f0] ss:$8 sps:$4 sm:$0xff]   ;;  %v1832_v50 = vld [vmem:[#allocation8 + $0x204] ss:$8 sps:$4 sm:$0xff]  }
  0x6c   :  { %v1898_v51 = vld [vmem:[#allocation8 + $0x70] ss:$8 sps:$4 sm:$0xff]   ;;  %v2299_v52 = vld [vmem:[#allocation3 + $0x10] sm:$0xff]  ;;  %v1835_v57 = vld [vmem:[#allocation8 + $0x214] ss:$8 sps:$4 sm:$0xff]   ;;  %s2133_s0 = scalar_lea.vmem %s1536_s17, 128 }
  0x6d   :  { %986 = vmatpush1.bf16.msra.mxu0 %v1796_v9  ;;  %939 = vmatpush1.bf16.msra.mxu1 %v1868_v31  ;;  %v2301_v53 = vld [vmem:[#allocation3 + $0x30] sm:$0xff]  ;;  %v1908_v60 = vld [vmem:[#allocation8 + $0x94] ss:$8 sps:$4 sm:$0xff]   ;;  %v1833_v61 = vld [vmem:[#allocation8 + $0x210] ss:$8 sps:$4 sm:$0xff]   ;;  %p2134_p12 = scmp.ne.s32.totalorder %s1536_s17, %s2133_s0  ;;  %p2139_p0 = scmp.lt.s32.totalorder %s2133_s0, %s2133_s0 }
  0x6e   :  { %987 = vmatprep.subr.bf16.mxu0 %v1797_v10  ;;  %940 = vmatprep.subr.bf16.mxu1 %v1872_v32  ;;  %v1902_v54 = vld [vmem:[#allocation8 + $0x84] ss:$8 sps:$4 sm:$0xff]   ;;  %v1830_v56 = vld [vmem:[#allocation8 + $0x200] ss:$8 sps:$4 sm:$0xff]   ;;  %v1557_v58 = vcombine.high %v2299_v52, %v2301_v53  ;;  %v1910_v63 = vld [vmem:[#allocation8 + $0x90] ss:$8 sps:$4 sm:$0xff]  }
  0x6f   :  { %v1904_v59 = vld [vmem:[#allocation8 + $0x80] ss:$8 sps:$4 sm:$0xff]   ;;  %v1838_v62 = vld [vmem:[#allocation8 + $0x224] ss:$8 sps:$4 sm:$0xff]   ;;  %v1841_v2 = vld [vmem:[#allocation8 + $0x234] ss:$8 sps:$4 sm:$0xff]   ;;  %p2140_p1 = por %p2139_p0, %p2138_p13 }
  0x70   :  { %v1914_v0 = vld [vmem:[#allocation8 + $0xa4] ss:$8 sps:$4 sm:$0xff]   ;;  %v1836_v1 = vld [vmem:[#allocation8 + $0x220] ss:$8 sps:$4 sm:$0xff]   ;;  %v1920_v4 = vld [vmem:[#allocation8 + $0xb4] ss:$8 sps:$4 sm:$0xff]  }
  0x71   :  { %988 = vmatpush1.bf16.msra.mxu0 %v1799_v11  ;;  %941 = vmatpush1.bf16.msra.mxu1 %v1874_v35  ;;  %v1916_v3 = vld [vmem:[#allocation8 + $0xa0] ss:$8 sps:$4 sm:$0xff]   ;;  %v1839_v5 = vld [vmem:[#allocation8 + $0x230] ss:$8 sps:$4 sm:$0xff]   ;;  %v1844_v6 = vld [vmem:[#allocation8 + $0x244] ss:$8 sps:$4 sm:$0xff]   ;;  %p2141_p2 = pnand %p2140_p1, %p2134_p12 }
  0x72   :  { %989 = vmatprep.subr.bf16.mxu0 %v1800_v12  ;;  %942 = vmatprep.subr.bf16.mxu1 %v1878_v36  ;;  %v1922_v7 = vld [vmem:[#allocation8 + $0xb0] ss:$8 sps:$4 sm:$0xff]   ;;  %v1926_v10 = vld [vmem:[#allocation8 + $0xc4] ss:$8 sps:$4 sm:$0xff]   ;;  %v1842_v12 = vld [vmem:[#allocation8 + $0x240] ss:$8 sps:$4 sm:$0xff]  }
  0x73   :  { %v107_v8 = vld [vmem:[#allocation3] sm:$0xff]  ;;  %v1928_v14 = vld [vmem:[#allocation8 + $0xc0] ss:$8 sps:$4 sm:$0xff]   ;;  %v1952_v27 = vld [vmem:[#allocation9 + $0x4] ss:$8 sps:$4 sm:$0xff]  }
  0x74   :  { %v111_v9 = vld [vmem:[#allocation3 + $0x20] sm:$0xff]  ;;  %v1940_v22 = vld [vmem:[#allocation8 + $0xe0] ss:$8 sps:$4 sm:$0xff]   ;;  %v1964_v36 = vld [vmem:[#allocation9 + $0x24] ss:$8 sps:$4 sm:$0xff]  }
  0x75   :  { %990 = vmatpush1.bf16.msra.mxu0 %v1802_v16  ;;  %943 = vmatpush1.bf16.msra.mxu1 %v1880_v39  ;;  %v1553_v11 = vcombine.high %v107_v8, %v111_v9  ;;  %v1847_v13 = vld [vmem:[#allocation8 + $0x254] ss:$8 sps:$4 sm:$0xff]   ;;  %v1845_v16 = vld [vmem:[#allocation8 + $0x250] ss:$8 sps:$4 sm:$0xff]   ;;  %v1857_v28 = vld [vmem:[#allocation8 + $0x280] ss:$8 sps:$4 sm:$0xff]  }
  0x76   :  { %991 = vmatprep.subr.bf16.mxu0 %v1803_v17  ;;  %944 = vmatprep.subr.bf16.mxu1 %v1884_v40  ;;  %v1932_v15 = vld [vmem:[#allocation8 + $0xd4] ss:$8 sps:$4 sm:$0xff]   ;;  %v1850_v17 = vld [vmem:[#allocation8 + $0x264] ss:$8 sps:$4 sm:$0xff]   ;;  %v1946_v26 = vld [vmem:[#allocation8 + $0xf0] ss:$8 sps:$4 sm:$0xff]  }
  0x77   :  { %966 = vmatprep.mubr.bf16.mxu1 %v1553_v11  ;;  %v1944_v23 = vld [vmem:[#allocation8 + $0xf4] ss:$8 sps:$4 sm:$0xff]   ;;  %v1950_v31 = vld [vmem:[#allocation9] ss:$8 sps:$4 sm:$0xff]   ;;  %v1863_v32 = vld [vmem:[#allocation8 + $0x290] ss:$8 sps:$4 sm:$0xff]  }
  0x78   :  { %v1956_v35 = vld [vmem:[#allocation9 + $0x10] ss:$8 sps:$4 sm:$0xff]   ;;  %v1877_v39 = vld [vmem:[#allocation8 + $0x2b4] ss:$8 sps:$4 sm:$0xff]   ;;  %v1962_v40 = vld [vmem:[#allocation9 + $0x20] ss:$8 sps:$4 sm:$0xff]  }
  0x79   :  { %992 = vmatpush1.bf16.msra.mxu0 %v1805_v18  ;;  %945 = vmatpush1.bf16.msra.mxu1 %v1886_v43  ;;  %v1934_v18 = vld [vmem:[#allocation8 + $0xd0] ss:$8 sps:$4 sm:$0xff]   ;;  %v1883_v43 = vld [vmem:[#allocation8 + $0x2c4] ss:$8 sps:$4 sm:$0xff]   ;;  %v1937_v11 = vld [vmem:[#allocation8 + $0x354] ss:$8 sps:$4 sm:$0xff]  }
  0x7a   :  { %993 = vmatprep.subr.bf16.mxu0 %v1806_v19  ;;  %946 = vmatprep.subr.bf16.mxu1 %v1890_v44  ;;  %v1938_v19 = vld [vmem:[#allocation8 + $0xe4] ss:$8 sps:$4 sm:$0xff]   ;;  %v1968_v44 = vld [vmem:[#allocation9 + $0x30] ss:$8 sps:$4 sm:$0xff]  }
  0x7d   :  { %994 = vmatpush1.bf16.msra.mxu0 %v1808_v20  ;;  %947 = vmatpush1.bf16.msra.mxu1 %v1892_v47  ;;  %v1848_v20 = vld [vmem:[#allocation8 + $0x260] ss:$8 sps:$4 sm:$0xff]   ;;  %v1889_v47 = vld [vmem:[#allocation8 + $0x2d4] ss:$8 sps:$4 sm:$0xff]  }
  0x7e   :  { %995 = vmatprep.subr.bf16.mxu0 %v1809_v21  ;;  %948 = vmatprep.subr.bf16.mxu1 %v1896_v48  ;;  %v1853_v21 = vld [vmem:[#allocation8 + $0x274] ss:$8 sps:$4 sm:$0xff]   ;;  %v1974_v48 = vld [vmem:[#allocation9 + $0x40] ss:$8 sps:$4 sm:$0xff]  }
  0x81   :  { %996 = vmatpush1.bf16.msra.mxu0 %v1811_v24  ;;  %949 = vmatpush1.bf16.msra.mxu1 %v1898_v51  ;;  %v1851_v24 = vld [vmem:[#allocation8 + $0x270] ss:$8 sps:$4 sm:$0xff]   ;;  %v1895_v51 = vld [vmem:[#allocation8 + $0x2e4] ss:$8 sps:$4 sm:$0xff]  }
  0x82   :  { %997 = vmatprep.subr.bf16.mxu0 %v1812_v25  ;;  %950 = vmatprep.subr.bf16.mxu1 %v1902_v54  ;;  %v1859_v25 = vld [vmem:[#allocation8 + $0x284] ss:$8 sps:$4 sm:$0xff]   ;;  %v1980_v54 = vld [vmem:[#allocation9 + $0x50] ss:$8 sps:$4 sm:$0xff]  }
  0x85   :  { %998 = vmatpush1.bf16.msra.mxu0 %v1814_v29  ;;  %951 = vmatpush1.bf16.msra.mxu1 %v1904_v59  ;;  %v1552_v29 = vcombine.low %v107_v8, %v111_v9  ;;  %v1994_v59 = vld [vmem:[#allocation9 + $0x74] ss:$8 sps:$4 sm:$0xff]   ;;  %v1917_v8 = vld [vmem:[#allocation8 + $0x320] ss:$8 sps:$4 sm:$0xff]   ;;  %v1931_v9 = vld [vmem:[#allocation8 + $0x344] ss:$8 sps:$4 sm:$0xff]  }
  0x86   :  { %999 = vmatprep.subr.bf16.mxu0 %v1815_v30  ;;  %952 = vmatprep.subr.bf16.mxu1 %v1908_v60  ;;  %v1865_v30 = vld [vmem:[#allocation8 + $0x294] ss:$8 sps:$4 sm:$0xff]   ;;  %v1899_v60 = vld [vmem:[#allocation8 + $0x2f0] ss:$8 sps:$4 sm:$0xff]  }
  0x89   :  { %1000 = vmatpush1.bf16.msra.mxu0 %v1817_v33  ;;  %953 = vmatpush1.bf16.msra.mxu1 %v1910_v63  ;;  %v1958_v33 = vld [vmem:[#allocation9 + $0x14] ss:$8 sps:$4 sm:$0xff]  }
  0x8a   :  { %1001 = vmatprep.subr.bf16.mxu0 %v1818_v34  ;;  %954 = vmatprep.subr.bf16.mxu1 %v1914_v0  ;;  %v1871_v34 = vld [vmem:[#allocation8 + $0x2a4] ss:$8 sps:$4 sm:$0xff]   ;;  %v2307_v63 = vld [vmem:[#allocation3 + $0x18] sm:$0xff] }
  0x8b   :  { %v2309_v0 = vld [vmem:[#allocation3 + $0x38] sm:$0xff] }
  0x8d   :  { %1002 = vmatpush1.bf16.msra.mxu0 %v1820_v37  ;;  %955 = vmatpush1.bf16.msra.mxu1 %v1916_v3  ;;  %v1869_v37 = vld [vmem:[#allocation8 + $0x2a0] ss:$8 sps:$4 sm:$0xff]   ;;  %v1998_v3 = vld [vmem:[#allocation6] sm:$0xff]  }
  0x8e   :  { %1003 = vmatprep.subr.bf16.mxu0 %v1821_v38  ;;  %956 = vmatprep.subr.bf16.mxu1 %v1920_v4  ;;  %v2174_v38 = vmov 0   ;;  %v1913_v4 = vld [vmem:[#allocation8 + $0x314] ss:$8 sps:$4 sm:$0xff]  }
  0x91   :  { %1004 = vmatpush1.bf16.msra.mxu0 %v1823_v41  ;;  %957 = vmatpush1.bf16.msra.mxu1 %v1922_v7  ;;  %v1970_v41 = vld [vmem:[#allocation9 + $0x34] ss:$8 sps:$4 sm:$0xff]   ;;  %v1919_v7 = vld [vmem:[#allocation8 + $0x324] ss:$8 sps:$4 sm:$0xff]  }
  0x92   :  { %1005 = vmatprep.subr.bf16.mxu0 %v1824_v42  ;;  %958 = vmatprep.subr.bf16.mxu1 %v1926_v10  ;;  %v1875_v42 = vld [vmem:[#allocation8 + $0x2b0] ss:$8 sps:$4 sm:$0xff]   ;;  %v1929_v10 = vld [vmem:[#allocation8 + $0x340] ss:$8 sps:$4 sm:$0xff]  }
  0x95   :  { %1006 = vmatpush1.bf16.msra.mxu0 %v1826_v45  ;;  %959 = vmatpush1.bf16.msra.mxu1 %v1928_v14  ;;  %v1976_v45 = vld [vmem:[#allocation9 + $0x44] ss:$8 sps:$4 sm:$0xff]   ;;  %v1941_v14 = vld [vmem:[#allocation8 + $0x360] ss:$8 sps:$4 sm:$0xff]  }
  0x96   :  { %1007 = vmatprep.subr.bf16.mxu0 %v1827_v46  ;;  %960 = vmatprep.subr.bf16.mxu1 %v1932_v15  ;;  %v1881_v46 = vld [vmem:[#allocation8 + $0x2c0] ss:$8 sps:$4 sm:$0xff]   ;;  %v1949_v15 = vld [vmem:[#allocation8 + $0x374] ss:$8 sps:$4 sm:$0xff]  }
  0x99   :  { %1008 = vmatpush1.bf16.msra.mxu0 %v1829_v49  ;;  %961 = vmatpush1.bf16.msra.mxu1 %v1934_v18  ;;  %v1982_v49 = vld [vmem:[#allocation9 + $0x54] ss:$8 sps:$4 sm:$0xff]   ;;  %v1953_v18 = vld [vmem:[#allocation8 + $0x380] ss:$8 sps:$4 sm:$0xff]  }
  0x9a   :  { %1020 = vmatprep.subr.bf16.mxu0 %v1832_v50  ;;  %962 = vmatprep.subr.bf16.mxu1 %v1938_v19  ;;  %v1887_v50 = vld [vmem:[#allocation8 + $0x2d0] ss:$8 sps:$4 sm:$0xff]   ;;  %v1961_v19 = vld [vmem:[#allocation8 + $0x394] ss:$8 sps:$4 sm:$0xff]  }
  0x9c   :  { %1010 = vmatmul.mubr.bf16.vlgmr.msra.gmra.mrb[0].mxu0 %v1554_v55  ;;  %v1988_v55 = vld [vmem:[#allocation9 + $0x64] ss:$8 sps:$4 sm:$0xff]  }
  0x9d   :  { %1021 = vmatpush1.bf16.msra.mxu0 %v1830_v56  ;;  %1052 = vmatprep.mubr.bf16.mxu0 %v1557_v58  ;;  %v1893_v56 = vld [vmem:[#allocation8 + $0x2e0] ss:$8 sps:$4 sm:$0xff]  }
  0x9e   :  { %1022 = vmatprep.subr.bf16.mxu0 %v1835_v57  ;;  %963 = vmatpush1.bf16.msra.mxu1 %v1940_v22  ;;  %v1901_v57 = vld [vmem:[#allocation8 + $0x2f4] ss:$8 sps:$4 sm:$0xff]   ;;  %v1986_v58 = vld [vmem:[#allocation9 + $0x60] ss:$8 sps:$4 sm:$0xff]  }
  0x9f   :  { %964 = vmatprep.subr.bf16.mxu1 %v1944_v23  ;;  %v1965_v22 = vld [vmem:[#allocation8 + $0x3a0] ss:$8 sps:$4 sm:$0xff]   ;;  %v1973_v23 = vld [vmem:[#allocation8 + $0x3b4] ss:$8 sps:$4 sm:$0xff]  }
  0xa1   :  { %1023 = vmatpush1.bf16.msra.mxu0 %v1833_v61  ;;  %v1907_v61 = vld [vmem:[#allocation8 + $0x304] ss:$8 sps:$4 sm:$0xff]  }
  0xa2   :  { %1024 = vmatprep.subr.bf16.mxu0 %v1838_v62  ;;  %965 = vmatpush1.bf16.msra.mxu1 %v1946_v26  ;;  %v1992_v62 = vld [vmem:[#allocation9 + $0x70] ss:$8 sps:$4 sm:$0xff]   ;;  %v1977_v26 = vld [vmem:[#allocation8 + $0x3c0] ss:$8 sps:$4 sm:$0xff]  }
  0xa3   :  { %1225 = vmatprep.subr.bf16.mxu1 %v1952_v27  ;;  %v1985_v27 = vld [vmem:[#allocation8 + $0x3d4] ss:$8 sps:$4 sm:$0xff]  }
  0xa5   :  { %1025 = vmatpush1.bf16.msra.mxu0 %v1836_v1  ;;  %967 = vmatmul.mubr.bf16.vlgmr.msra.gmra.mrb[0].mxu1 %v1552_v29  ;;  %v1556_v1 = vcombine.low %v2299_v52, %v2301_v53  ;;  %v1925_v52 = vld [vmem:[#allocation8 + $0x334] ss:$8 sps:$4 sm:$0xff]   ;;  %v1923_v53 = vld [vmem:[#allocation8 + $0x330] ss:$8 sps:$4 sm:$0xff]   ;;  %v1991_v29 = vld [vmem:[#allocation8 + $0x3e4] ss:$8 sps:$4 sm:$0xff]  }
  0xa6   :  { %1026 = vmatprep.subr.bf16.mxu0 %v1841_v2  ;;  %1226 = vmatpush1.bf16.msra.mxu1 %v1950_v31  ;;  %v1905_v2 = vld [vmem:[#allocation8 + $0x300] ss:$8 sps:$4 sm:$0xff]   ;;  %v1997_v31 = vld [vmem:[#allocation8 + $0x3f4] ss:$8 sps:$4 sm:$0xff]  }
  0xa7   :  { %1227 = vmatprep.subr.bf16.mxu1 %v1958_v33  ;;  %1257 = vmatprep.mubr.bf16.mxu1 %v2174_v38  ;;  %v1558_v33 = vcombine.low %v2307_v63, %v2309_v0 }
  0xa9   :  { %1027 = vmatpush1.bf16.msra.mxu0 %v1839_v5  ;;  %v1559_v5 = vcombine.high %v2307_v63, %v2309_v0 }
  0xaa   :  { %1028 = vmatprep.subr.bf16.mxu0 %v1844_v6  ;;  %1228 = vmatpush1.bf16.msra.mxu1 %v1956_v35  ;;  %v1911_v6 = vld [vmem:[#allocation8 + $0x310] ss:$8 sps:$4 sm:$0xff]  }
  0xab   :  { %1229 = vmatprep.subr.bf16.mxu1 %v1964_v36 }
  0xad   :  { %1029 = vmatpush1.bf16.msra.mxu0 %v1842_v12  ;;  %v1935_v12 = vld [vmem:[#allocation8 + $0x350] ss:$8 sps:$4 sm:$0xff]  }
  0xae   :  { %1030 = vmatprep.subr.bf16.mxu0 %v1847_v13  ;;  %1230 = vmatpush1.bf16.msra.mxu1 %v1962_v40  ;;  %v1943_v13 = vld [vmem:[#allocation8 + $0x364] ss:$8 sps:$4 sm:$0xff]  }
  0xaf   :  { %1231 = vmatprep.subr.bf16.mxu1 %v1970_v41 }
  0xb1   :  { %1031 = vmatpush1.bf16.msra.mxu0 %v1845_v16  ;;  %v1947_v16 = vld [vmem:[#allocation8 + $0x370] ss:$8 sps:$4 sm:$0xff]  }
  0xb2   :  { %1032 = vmatprep.subr.bf16.mxu0 %v1850_v17  ;;  %1232 = vmatpush1.bf16.msra.mxu1 %v1968_v44  ;;  %v1955_v17 = vld [vmem:[#allocation8 + $0x384] ss:$8 sps:$4 sm:$0xff]   ;;  %v1549_v44 = vld [vmem:[%s2411_s5 + $0x1] ss:$4 sm:$0x3] }
  0xb3   :  { %1233 = vmatprep.subr.bf16.mxu1 %v1976_v45 }
  0xb5   :  { %1033 = vmatpush1.bf16.msra.mxu0 %v1848_v20  ;;  %v1959_v20 = vld [vmem:[#allocation8 + $0x390] ss:$8 sps:$4 sm:$0xff]  }
  0xb6   :  { %1034 = vmatprep.subr.bf16.mxu0 %v1853_v21  ;;  %1234 = vmatpush1.bf16.msra.mxu1 %v1974_v48  ;;  %v1967_v21 = vld [vmem:[#allocation8 + $0x3a4] ss:$8 sps:$4 sm:$0xff]   ;;  %v100_v48 = vld [vmem:[%s2411_s5] ss:$4 sm:$0x3] }
  0xb7   :  { %1235 = vmatprep.subr.bf16.mxu1 %v1982_v49 }
  0xb9   :  { %1035 = vmatpush1.bf16.msra.mxu0 %v1851_v24  ;;  %v1971_v24 = vld [vmem:[#allocation8 + $0x3b0] ss:$8 sps:$4 sm:$0xff]  }
  0xba   :  { %1036 = vmatprep.subr.bf16.mxu0 %v1859_v25  ;;  %1236 = vmatpush1.bf16.msra.mxu1 %v1980_v54  ;;  %v1979_v25 = vld [vmem:[#allocation8 + $0x3c4] ss:$8 sps:$4 sm:$0xff]  }
  0xbb   :  { %1237 = vmatprep.subr.bf16.mxu1 %v1988_v55  ;;  %v1551_v55 = vld [vmem:[%s2411_s5 + $0x3] ss:$4 sm:$0x3] }
  0xbd   :  { %1037 = vmatpush1.bf16.msra.mxu0 %v1857_v28  ;;  %v1983_v28 = vld [vmem:[#allocation8 + $0x3d0] ss:$8 sps:$4 sm:$0xff]  }
  0xbe   :  { %1038 = vmatprep.subr.bf16.mxu0 %v1865_v30  ;;  %1238 = vmatpush1.bf16.msra.mxu1 %v1986_v58  ;;  %v1989_v30 = vld [vmem:[#allocation8 + $0x3e0] ss:$8 sps:$4 sm:$0xff]  }
  0xbf   :  { %1239 = vmatprep.subr.bf16.mxu1 %v1994_v59 }
  0xc1   :  { %1039 = vmatpush1.bf16.msra.mxu0 %v1863_v32  ;;  %v1995_v32 = vld [vmem:[#allocation8 + $0x3f0] ss:$8 sps:$4 sm:$0xff]  }
  0xc2   :  { %1040 = vmatprep.subr.bf16.mxu0 %v1871_v34  ;;  %1240 = vmatpush1.bf16.msra.mxu1 %v1992_v62 }
  0xc5   :  { %1041 = vmatpush1.bf16.msra.mxu0 %v1869_v37  ;;  %1258 = vmatmul.mubr.bf16.vlgmr.msra.gmra.mrb[4].mxu1 %v1998_v3 }
  0xc6   :  { %1042 = vmatprep.subr.bf16.mxu0 %v1877_v39 }
  0xc9   :  { %1043 = vmatpush1.bf16.msra.mxu0 %v1875_v42  ;;  %v244_v42 = vlaneseq }
  0xca   :  { %1044 = vmatprep.subr.bf16.mxu0 %v1883_v43 }
  0xcb   :  { %v245_v43 = vshrl.u32 %v244_v42, 7  ;;  %v2009_v42 = vld [vmem:[#allocation11 + $0x68] sm:$0xff]  }
  0xcd   :  { %1045 = vmatpush1.bf16.msra.mxu0 %v1881_v46  ;;  %v246_v45 = vsub.s32 0, %v245_v43  ;;  %v250_v46 = vsub.s32 1, %v245_v43  ;;  %v2010_v43 = vld [vmem:[#allocation11 + $0x28] sm:$0xff]  }
  0xce   :  { %1046 = vmatprep.subr.bf16.mxu0 %v1889_v47 }
  0xcf   :  { %v1132_v47 = vrot.slane %v1549_v44, %v246_v45  ;;  %v1136_v49 = vrot.slane %v1549_v44, %v250_v46  ;;  %v251_v54 = vrot.slane %v100_v48, %v250_v46  ;;  %v1295_v0 = vrot.slane %v1551_v55, %v250_v46  ;;  %v2011_v44 = vld [vmem:[#allocation11 + $0x70] sm:$0xff]  }
  0xd1   :  { %1047 = vmatpush1.bf16.msra.mxu0 %v1887_v50  ;;  %v247_v50 = vrot.slane %v100_v48, %v246_v45  ;;  %v1313_v48 = vstv %s2413_s7 }
  0xd2   :  { %1048 = vmatprep.subr.bf16.mxu0 %v1895_v51 }
  0xd5   :  { %1049 = vmatpush1.bf16.msra.mxu0 %v1893_v56 }
  0xd6   :  { %1050 = vmatprep.subr.bf16.mxu0 %v1901_v57  ;;  %v1550_v57 = vld [vmem:[%s2411_s5 + $0x2] ss:$4 sm:$0x3] }
  0xd9   :  { %1051 = vmatpush1.bf16.msra.mxu0 %v1899_v60  ;;  %v1291_v60 = vrot.slane %v1551_v55, %v246_v45 }
  0xda   :  { %1063 = vmatprep.subr.bf16.mxu0 %v1907_v61 }
  0xdc   :  { %1053 = vmatmul.mubr.bf16.vlgmr.msra.gmra.mrb[0].mxu0 %v1556_v1 }
  0xdd   :  { %1064 = vmatpush1.bf16.msra.mxu0 %v1905_v2  ;;  %1095 = vmatprep.mubr.bf16.mxu0 %v1559_v5  ;;  %v1276_v5 = vrot.slane %v1550_v57, %v246_v45  ;;  %v2012_v45 = vld [vmem:[#allocation11 + $0x30] sm:$0xff]  }
  0xde   :  { %1065 = vmatprep.subr.bf16.mxu0 %v1913_v4 }
  0xe1   :  { %1066 = vmatpush1.bf16.msra.mxu0 %v1911_v6 }
  0xe2   :  { %1067 = vmatprep.subr.bf16.mxu0 %v1919_v7 }
  0xe5   :  { %1068 = vmatpush1.bf16.msra.mxu0 %v1917_v8 }
  0xe6   :  { %1069 = vmatprep.subr.bf16.mxu0 %v1925_v52  ;;  %v1280_v52 = vrot.slane %v1550_v57, %v250_v46  ;;  %v2013_v46 = vld [vmem:[#allocation11 + $0x78] sm:$0xff]  }
  0xe9   :  { %1070 = vmatpush1.bf16.msra.mxu0 %v1923_v53 }
  0xea   :  { %1071 = vmatprep.subr.bf16.mxu0 %v1931_v9 }
  0xed   :  { %1072 = vmatpush1.bf16.msra.mxu0 %v1929_v10 }
  0xee   :  { %1073 = vmatprep.subr.bf16.mxu0 %v1937_v11 }
  0xf1   :  { %1074 = vmatpush1.bf16.msra.mxu0 %v1935_v12 }
  0xf2   :  { %1075 = vmatprep.subr.bf16.mxu0 %v1943_v13 }
  0xf5   :  { %1076 = vmatpush1.bf16.msra.mxu0 %v1941_v14 }
  0xf6   :  { %1077 = vmatprep.subr.bf16.mxu0 %v1949_v15 }
  0xf9   :  { %1078 = vmatpush1.bf16.msra.mxu0 %v1947_v16 }
  0xfa   :  { %1079 = vmatprep.subr.bf16.mxu0 %v1955_v17 }
  0xfd   :  { %1080 = vmatpush1.bf16.msra.mxu0 %v1953_v18 }
  0xfe   :  { %1081 = vmatprep.subr.bf16.mxu0 %v1961_v19 }
 0x101   :  { %1082 = vmatpush1.bf16.msra.mxu0 %v1959_v20 }
 0x102   :  { %1083 = vmatprep.subr.bf16.mxu0 %v1967_v21 }
 0x105   :  { %1084 = vmatpush1.bf16.msra.mxu0 %v1965_v22 }
 0x106   :  { %1085 = vmatprep.subr.bf16.mxu0 %v1973_v23 }
 0x109   :  { %1086 = vmatpush1.bf16.msra.mxu0 %v1971_v24 }
 0x10a   :  { %1087 = vmatprep.subr.bf16.mxu0 %v1979_v25 }
 0x10d   :  { %1088 = vmatpush1.bf16.msra.mxu0 %v1977_v26 }
 0x10e   :  { %1089 = vmatprep.subr.bf16.mxu0 %v1985_v27 }
 0x111   :  { %1090 = vmatpush1.bf16.msra.mxu0 %v1983_v28 }
 0x112   :  { %1091 = vmatprep.subr.bf16.mxu0 %v1991_v29 }
 0x115   :  { %1092 = vmatpush1.bf16.msra.mxu0 %v1989_v30 }
 0x116   :  { %1093 = vmatprep.subr.bf16.mxu0 %v1997_v31 }
 0x119   :  { %1094 = vmatpush1.bf16.msra.mxu0 %v1995_v32  ;;  %v1999_v32 = vld [vmem:[#allocation11 + $0x40] sm:$0xff]  }
 0x11a   :  { %1731 = vmatprep.subr.bf16.mxu1 %v1999_v32 }
 0x11c   :  { %1096 = vmatmul.mubr.bf16.vlgmr.msra.gmra.mrb[0].mxu0 %v1558_v33  ;;  %v2000_v33 = vld [vmem:[#allocation11] sm:$0xff]  }
 0x11d   :  { %1732 = vmatpush3.bf16.msra.mxu1 %v2000_v33 }
 0x178   :  { %v968_v34 = vpop.f32.mrb[0].mxu1 }
 0x179   :  { %v970_v35 = vpop.f32.mrb[1].mxu1  ;;  %v969_v58 = vadd.f32 %v968_v34, %v247_v50  ;;  %v2001_v34 = vld [vmem:[#allocation11 + $0x48] sm:$0xff]  }
 0x17a   :  { %v972_v36 = vpop.f32.mrb[2].mxu1  ;;  %v971_v62 = vadd.f32 %v970_v35, %v251_v54  ;;  %v2002_v35 = vld [vmem:[#allocation11 + $0x8] sm:$0xff]   ;;  %1733 = vmatprep.subr.bf16.mxu1 %v2001_v34 }
 0x17b   :  { %v974_v37 = vpop.f32.mrb[3].mxu1  ;;  %v973_v3 = vadd.f32 %v972_v36, %v247_v50  ;;  %1734 = vmatpush3.bf16.msra.mxu1 %v2002_v35  ;;  %v2003_v36 = vld [vmem:[#allocation11 + $0x50] sm:$0xff]  }
 0x17c   :  { %v975_v7 = vadd.f32 %v974_v37, %v251_v54  ;;  %v2004_v37 = vld [vmem:[#allocation11 + $0x10] sm:$0xff]   ;;  %1735 = vmatprep.subr.bf16.mxu1 %v2003_v36 }
 0x17f   :  { %1736 = vmatpush3.bf16.msra.mxu1 %v2004_v37 }
 0x198   :  { %v1259_v38 = vpop.f32.mrb[4].mxu1 }
 0x199   :  { %v1261_v39 = vpop.f32.mrb[5].mxu1  ;;  %v2323_v51 = vadd.f32 %v1259_v38, %v1132_v47  ;;  %v2005_v38 = vld [vmem:[#allocation11 + $0x58] sm:$0xff]  }
 0x19a   :  { %v1263_v40 = vpop.f32.mrb[6].mxu1  ;;  %v2328_v56 = vadd.f32 %v1261_v39, %v1136_v49  ;;  %v2006_v39 = vld [vmem:[#allocation11 + $0x18] sm:$0xff]   ;;  %1737 = vmatprep.subr.bf16.mxu1 %v2005_v38 }
 0x19b   :  { %v1265_v41 = vpop.f32.mrb[7].mxu1  ;;  %v1268_v59 = vmax.f32 %v2323_v51, 0.0  ;;  %v2334_v61 = vadd.f32 %v1263_v40, %v1132_v47  ;;  %v2007_v40 = vld [vmem:[#allocation11 + $0x60] sm:$0xff]   ;;  %1738 = vmatpush3.bf16.msra.mxu1 %v2006_v39  ;;  %v2014_v47 = vld [vmem:[#allocation11 + $0x38] sm:$0xff]  }
 0x19c   :  { %v1269_v63 = vmax.f32 %v2328_v56, 0.0  ;;  %v2337_v2 = vadd.f32 %v1265_v41, %v1136_v49  ;;  %v2008_v41 = vld [vmem:[#allocation11 + $0x20] sm:$0xff]   ;;  %1739 = vmatprep.subr.bf16.mxu1 %v2007_v40 }
 0x19d   :  { %v1298_v9 = vmul.f32 %v1291_v60, %v1268_v59  ;;  %v1270_v10 = vmax.f32 %v2334_v61, 0.0 }
 0x19e   :  { %v1299_v14 = vmul.f32 %v1295_v0, %v1269_v63  ;;  %v1271_v15 = vmax.f32 %v2337_v2, 0.0  ;;  %v1705_v2 = vld [vmem:[%s2412_s6] ss:$0 sm:$0xff] }
 0x19f   :  { %v1300_v24 = vmul.f32 %v1291_v60, %v1270_v10  ;;  %1740 = vmatpush3.bf16.msra.mxu1 %v2008_v41 }
 0x1a0   :  { %v1301_v25 = vmul.f32 %v1295_v0, %v1271_v15  ;;  %1741 = vmatprep.subr.bf16.mxu1 %v2009_v42 }
 0x1a3   :  { %1742 = vmatpush3.bf16.msra.mxu1 %v2010_v43 }
 0x1a4   :  { %1743 = vmatprep.subr.bf16.mxu1 %v2011_v44 }
 0x1a7   :  { %1744 = vmatpush3.bf16.msra.mxu1 %v2012_v45 }
 0x1a8   :  { %1745 = vmatprep.subr.bf16.mxu1 %v2013_v46 }
 0x1ab   :  { %1746 = vmatpush3.bf16.msra.mxu1 %v2014_v47 }
 0x1ef   :  { %v1097_v1 = vpop.f32.mrb[0].mxu0 }
 0x1f0   :  { %v2339_v4 = vadd.f32 %v1097_v1, %v969_v58  ;;  %v1099_v6 = vpop.f32.mrb[1].mxu0 }
 0x1f1   :  { %v2341_v8 = vadd.f32 %v1099_v6, %v971_v62  ;;  %v1101_v53 = vpop.f32.mrb[2].mxu0 }
 0x1f2   :  { %v1106_v11 = vmax.f32 %v2339_v4, 0.0  ;;  %v2347_v12 = vadd.f32 %v1101_v53, %v973_v3  ;;  %v1103_v13 = vpop.f32.mrb[3].mxu0 }
 0x1f3   :  { %v1107_v16 = vmax.f32 %v2341_v8, 0.0  ;;  %v2353_v17 = vadd.f32 %v1103_v13, %v975_v7 }
 0x1f4   :  { %v1283_v18 = vmul.f32 %v1276_v5, %v1106_v11  ;;  %v1108_v19 = vmax.f32 %v2347_v12, 0.0 }
 0x1f5   :  { %v1284_v20 = vmul.f32 %v1280_v52, %v1107_v16  ;;  %v1109_v21 = vmax.f32 %v2353_v17, 0.0 }
 0x1f6   :  { %v1285_v22 = vmul.f32 %v1276_v5, %v1108_v19  ;;  %v1302_v23 = vadd.f32 %v1298_v9, %v1283_v18 }
 0x1f7   :  { %v1286_v26 = vmul.f32 %v1280_v52, %v1109_v21  ;;  %v1303_v27 = vadd.f32 %v1299_v14, %v1284_v20 }
 0x1f8   :  { %v1304_v29 = vadd.f32 %v1300_v24, %v1285_v22 }
 0x1f9   :  { %v1306_v28 = vadd.f32 %v1303_v27, %v1302_v23  ;;  %v1305_v30 = vadd.f32 %v1301_v25, %v1286_v26 }
 0x1fb   :  { %1307 = vadd.xlane.f32.xlu0 %v1306_v28  ;;  %v1309_v31 = vadd.f32 %v1305_v30, %v1304_v29 }
 0x1ff   :  { %1310 = vadd.xlane.f32.xlu0 %v1309_v31 }
 0x288   :  { %v1308_v49 = vpop.xlane.xlu0 %1307 }
 0x289   :  { %v1314_v50 = vadd.f32 %v1313_v48, %v1308_v49 }
 0x28b   :  { %v1316_v54 = vsub.f32 0.0, %v1314_v50 }
 0x28c   :  { %v1311_v55 = vpop.xlane.xlu0 %1310 }
 0x28d   :  { %v1318_v57 = vmul.f32 1.442695, %v1316_v54  ;;  %v1315_v58 = vadd.f32 %v1313_v48, %v1311_v55 }
 0x28f   :  { %2015 = vpow2.f32 %v1318_v57  ;;  %v1317_v60 = vsub.f32 0.0, %v1315_v58 }
 0x291   :  { %v1320_v62 = vmul.f32 1.442695, %v1317_v60 }
 0x293   :  { %2017 = vpow2.f32 %v1320_v62 }
 0x299   :  { %v2016_v0 = vpop.eup %2015 }
 0x29a   :  { %v1322_v1 = vadd.f32 1.0, %v2016_v0 }
 0x29c   :  { %2019 = vrcp.f32 %v1322_v1 }
 0x29d   :  { %v2018_v3 = vpop.eup %2017 }
 0x29e   :  { %v1323_v5 = vadd.f32 1.0, %v2018_v3 }
 0x2a0   :  { %2021 = vrcp.f32 %v1323_v5 }
 0x2a6   :  { %v2020_v6 = vpop.eup %2019 }
 0x2a7   :  { %v1332_v7 = vsub.f32 1.0, %v2020_v6  ;;  %v1329_v14 = vmul.f32 %v2020_v6, %v1107_v16  ;;  %v1328_v18 = vmul.f32 %v2020_v6, %v1106_v11 }
 0x2a9   :  { %v1335_v9 = vmul.f32 %v1332_v7, %v1269_v63  ;;  %v1334_v13 = vmul.f32 %v1332_v7, %v1268_v59 }
 0x2aa   :  { %v2022_v52 = vpop.eup %2021 }
 0x2ab   :  { %v1333_v53 = vsub.f32 1.0, %v2022_v52  ;;  %v1331_v20 = vmul.f32 %v2022_v52, %v1109_v21  ;;  %v1330_v23 = vmul.f32 %v2022_v52, %v1108_v19  ;;  %v1339_v51 = vadd.f32 %v1335_v9, %v1329_v14 }
 0x2ac   :  { %v1338_v63 = vadd.f32 %v1334_v13, %v1328_v18 }
 0x2ad   :  { %v1337_v22 = vmul.f32 %v1333_v53, %v1271_v15  ;;  %v1336_v56 = vmul.f32 %v1333_v53, %v1270_v10 }
 0x2af   :  { %v1341_v59 = vadd.f32 %v1337_v22, %v1331_v20  ;;  %v1340_v8 = vadd.f32 %v1336_v56, %v1330_v23 }
 0x2b1   :  { %v1343_v16 = vpack.c.bf16 %v1341_v59, %v1339_v51  ;;  %v1342_v24 = vpack.c.bf16 %v1340_v8, %v1338_v63 }
 0x2b3   :  { %1511 = vmatprep.mubr.bf16.mxu1 %v1343_v16 }
 0x2b4   :  { %1512 = vmatmul.mubr.bf16.vlgmr.msra.gmra.mrb[8].mxu1 %v1342_v24 }
 0x387   :  { %v1747_v4 = vpop.f32.mrb[8].mxu1 }
 0x388   :  { %v1748_v11 = vpop.f32.mrb[9].mxu1 }
 0x389   :  { %v1749_v17 = vadd.f32 %v1748_v11, %v1747_v4  ;;  %v1750_v21 = vpop.f32.mrb[10].mxu1 }
 0x38a   :  { %v1751_v12 = vpop.f32.mrb[11].mxu1 }
 0x38b   :  { %v1752_v15 = vadd.f32 %v1751_v12, %v1750_v21  ;;  %v1514_v61 = vadd.f32 %v1749_v17, %v1705_v2 }
 0x38d   :  { %v1517_v10 = vadd.f32 %v1752_v15, %v1705_v2 }
 0x38f   :  { %v1729_v19 = vpack.c.bf16 %v1517_v10, %v1514_v61 }
 0x391   :  { %1730 = vst [vmem:[#allocation12] sm:$0xff] %v1729_v19  }
 0x392   :  { %2144 = shalt.err (!%p2141_p2)
}
 0x393   :  { %s2145_s6 = scalar_lea.hbm %s2414_s8, 128 }
 0x394   :  { %p2146_p3 = scmp.ne.s32.totalorder %s2414_s8, %s2145_s6  ;;  %p2149_p4 = scmp.lt.u32.totalorder %s2145_s6, %s2414_s8 }
 0x396   :  { %p2151_p5 = pnand %p2149_p4, %p2146_p3 }
 0x398   :  { %2154 = shalt.err (!%p2151_p5)
}
 0x399   :  { %1541 = dma.vmem_to_hbm [thread:$0]  %s1536_s17, 128, %s2414_s8, [#allocation5], %s2164_s15, %s2164_s15, %s2165_s16  }
 0x39a   :  { %2161 = dma.done.wait [#allocation5], 128  }
 0x39b   :  { %2162 = vsyncadd [#allocation5], 4294967168 }
 0x39c   :  { %1545 = vsyncpa [#allocation4], 1 }
 0x39d   :  { %1546 = vsyncpa [#allocation7], 1 }
 0x39e   :  { %1547 = vsyncpa [#allocation10], 1 }
 0x39f   :  { %1548 = vsyncpa [#allocation5], 1 }

</bundles_post_ra>
